<compile_context>
chip_gen: v6e
topology: v6e:2x2x1
jax: 0.10.0
libtpu: 0.0.40
codegen_flags: <defaults>
</compile_context>

<pallas_src>
import functools

import jax
import jax.numpy as jnp
from jax.experimental import pallas as pl
from jax.experimental.pallas import tpu as pltpu


def _cpa_task_head_kernel(x_ref, w_ref, o_ref, *, d, fuse_k):
    """One (O-tile, batch-tile) grid step.

    x_ref: (TB, C*D)  activations, chunk-major along lanes (any float dtype)
    w_ref: (K, TN)    bf16 fused weights; K == 2*d ([Wa^T ; Wb^T]) or d (C==1)
    o_ref: (TB, TN)   output tile
    """
    c = x_ref.shape[1] // d
    two_heads = w_ref.shape[0] == 2 * d      # False when num_chunks == 1

    x0 = x_ref[:, :d]                        # chunk 0 -> A head
    if two_heads:
        # Chunk sum in f32 (VPU adds; f32 accumulation mandatory on v5e).
        rest = x_ref[:, d:2 * d].astype(jnp.float32)
        for k in range(2, c):
            rest = rest + x_ref[:, k * d:(k + 1) * d].astype(jnp.float32)
        if fuse_k:
            # Fused K=2D operand: fills the 256-deep MXU (v6e/v7x) in one pass.
            x_cat = jnp.concatenate(
                [x0.astype(w_ref.dtype), rest.astype(w_ref.dtype)], axis=-1)
            acc = jnp.dot(x_cat, w_ref[...], preferred_element_type=jnp.float32)
        else:
            # 128-deep MXU (v5e & older): two K=D passes, no concat temporary.
            acc = jnp.dot(x0.astype(w_ref.dtype), w_ref[:d, :],
                          preferred_element_type=jnp.float32)
            acc = acc + jnp.dot(rest.astype(w_ref.dtype), w_ref[d:, :],
                                preferred_element_type=jnp.float32)
    else:
        # num_chunks == 1: single head, single K=D matmul.
        acc = jnp.dot(x0.astype(w_ref.dtype), w_ref[...],
                      preferred_element_type=jnp.float32)

    o_ref[...] = acc.astype(o_ref.dtype)


def _mxu_is_256_deep():
    """True on v6e/v7x (256-deep MXU); False on v5e and older (128-deep)."""
    try:
        kind = jax.devices()[0].device_kind.lower()
    except Exception:
        return True
    return not any(v in kind for v in ("v2", "v3", "v4", "v5"))


def _pick_block_b(batch, row_bytes, target=512, block_budget=4 << 20):
    """Largest sublane-aligned batch tile <= target fitting the VMEM budget."""
    b8 = ((batch + 7) // 8) * 8
    tb = min(target, b8)
    while tb > 8 and tb * row_bytes > block_budget:
        tb = ((tb // 2 + 7) // 8) * 8
    return max(tb, 8)


def _pick_block_o(out_size, k, block_b, n_batch_tiles, block_budget=4 << 20):
    """O tile: multiple of 128 dividing O, budgeted for weight & output blocks.

    With only one batch tile, prefer >= 2 O tiles so the "parallel" O axis
    still gives v7x's two TensorCores something to shard (and halves the
    per-core weight DMA).
    """
    if out_size % 128 != 0:
        return out_size                    # full-dim block (legal; masked lane stores)
    cands = [t for t in range(out_size, 0, -128) if out_size % t == 0]
    want_split = (n_batch_tiles < 2 and out_size >= 256)

    def fits(t):
        return k * t * 2 <= block_budget and block_b * t * 4 <= block_budget

    for t in cands:
        if fits(t) and (not want_split or out_size // t >= 2):
            return t
    return 128


def cpa_task_head(x, w_a, w_b, *, block_b=None, block_o=None,
                  weight_dtype=jnp.bfloat16, out_dtype=jnp.float32):
    """CpaTaskHead forward.

    x   : [B, C, D]  (C == num_chunks), f32 or bf16
    w_a : [O, D]     bias-free nn.Linear weight of head A
    w_b : [O, D]     bias-free nn.Linear weight of head B
    returns [B, O] in out_dtype (f32 by default; pass bf16 to halve writeback)
    """
    B, C, D = x.shape
    O = w_a.shape[0]
    assert w_a.shape == (O, D) and w_b.shape == (O, D)
    assert D % 128 == 0, "input_size must be lane-aligned (multiple of 128)"

    # Free layout plumbing: merging the contiguous (C, D) minor dims is a
    # bitcast-level reshape -- unlike the old transpose, it costs no HBM pass.
    x2d = x.reshape(B, C * D)

    # Fused weights [Wa^T ; Wb^T] (only Wa^T when num_chunks == 1), bf16.
    # One-time O(D*O) prep on the small weights; in a real model this would be
    # folded into parameter storage.
    if C > 1:
        w_cat = jnp.concatenate([w_a.T, w_b.T], axis=0).astype(weight_dtype)
    else:
        w_cat = w_a.T.astype(weight_dtype)
    K = w_cat.shape[0]

    x_itemsize = jnp.dtype(x.dtype).itemsize
    w_itemsize = jnp.dtype(weight_dtype).itemsize
    o_itemsize = jnp.dtype(out_dtype).itemsize

    if block_b is None:
        block_b = _pick_block_b(B, C * D * x_itemsize)
    n_b = pl.cdiv(B, block_b)
    if block_o is None:
        block_o = _pick_block_o(O, K, block_b, n_b)
    n_o = pl.cdiv(O, block_o)

    kernel = functools.partial(_cpa_task_head_kernel, d=D,
                               fuse_k=_mxu_is_256_deep())

    # Explicit VMEM budget: double-buffered act/weight/out blocks + the fused
    # (TB, K) MXU operand, with 2x headroom (review #4).
    blocks_bytes = (2 * block_b * C * D * x_itemsize      # activations (2 bufs)
                    + 2 * K * block_o * w_itemsize        # weights     (2 bufs)
                    + 2 * block_b * block_o * o_itemsize  # output      (2 bufs)
                    + 2 * block_b * K * w_itemsize)       # x_cat temp
    vmem_limit = int(min(64 << 20, max(2 * blocks_bytes, 16 << 20)))

    cost = pl.CostEstimate(
        flops=2 * B * K * O,
        bytes_accessed=int(x2d.size * x_itemsize + w_cat.size * w_itemsize
                           + B * O * o_itemsize),
        transcendentals=0)

    return pl.pallas_call(
        kernel,
        out_shape=jax.ShapeDtypeStruct((B, O), out_dtype),
        grid_spec=pl.GridSpec(
            # O axis OUTERMOST: each weight tile is DMA'd once and reused over
            # all batch tiles.  Both axes are independent -> "parallel".
            grid=(n_o, n_b),
            in_specs=[
                # Activation tile marches over the batch (double-buffered).
                # Its index ignores j, so with a single batch tile it stays
                # VMEM-resident across all O tiles.
                pl.BlockSpec((block_b, C * D), lambda j, i: (i, 0)),
                # Weight tile: constant over the batch axis -> fetched once
                # per O tile.
                pl.BlockSpec((K, block_o), lambda j, i: (0, j)),
            ],
            # Lane-dense output tile (block_o is a multiple of 128 whenever O is).
            out_specs=pl.BlockSpec((block_b, block_o), lambda j, i: (i, j)),
        ),
        compiler_params=pltpu.CompilerParams(
            dimension_semantics=("parallel", "parallel"),
            vmem_limit_bytes=vmem_limit),
        cost_estimate=cost,
    )(x2d, w_cat)
    # TODO(synk): single-buffer the resident weight (pipeline_mode=pl.Buffered(1))
    # once buffer_count=1 is verified on the target jax version; the O-tile
    # budget above already keeps the double-buffered copy small.
    # TODO(synk): when both weights and activations are huge (n_o > 1 and
    # n_b > 1), pick the grid-axis order by comparing n_o*act_bytes vs
    # n_b*weight_bytes re-read traffic instead of always putting O outermost.


if __name__ == "__main__":
    def reference_f32(x, w_a, w_b):
        y = x[:, 0, :] @ w_a.T
        for c in range(1, x.shape[1]):
            y = y + x[:, c, :] @ w_b.T
        return y

    key = jax.random.PRNGKey(0)

    # Small shapes consistent with the module's forward (x: [B, num_chunks, D]).
    for (batch, num_chunks, input_size, output_size) in [(16, 3, 128, 256),
                                                         (16, 1, 128, 256)]:
        kx, ka, kb, key = jax.random.split(key, 4)
        x = jax.random.normal(kx, (batch, num_chunks, input_size), jnp.float32)
        w_a = jax.random.normal(ka, (output_size, input_size), jnp.float32) * 0.02
        w_b = jax.random.normal(kb, (output_size, input_size), jnp.float32) * 0.02

        y = jax.block_until_ready(cpa_task_head(x, w_a, w_b))
        assert y.shape == (batch, output_size)

        # Module-faithful f32 reference (the PyTorch forward).
        y_f32 = reference_f32(x, w_a, w_b)

        # bf16-emulated reference (same math/dtypes the kernel uses).
        x0 = x[:, 0, :].astype(jnp.bfloat16)
        rest = jnp.sum(x[:, 1:, :], axis=1).astype(jnp.bfloat16)
        y_bf16 = (jnp.dot(x0, w_a.T.astype(jnp.bfloat16),
                          preferred_element_type=jnp.float32)
                  + jnp.dot(rest, w_b.T.astype(jnp.bfloat16),
                            preferred_element_type=jnp.float32))

        assert jnp.allclose(y, y_bf16, atol=5e-3, rtol=5e-3), "mismatch vs bf16 ref"
        assert jnp.allclose(y, y_f32, atol=3e-2, rtol=3e-2), "mismatch vs f32 ref"

    print("KERNEL_OK")
</pallas_src>

<mosaic_0001>
module attributes {stable_mosaic.version = 11 : i64} {
  func.func @_cpa_task_head_kernel(%arg0: i32, %arg1: i32, %arg2: memref<16x384xf32, #tpu.memory_space<vmem>>, %arg3: memref<256x128xbf16, #tpu.memory_space<vmem>>, %arg4: memref<16x128xf32, #tpu.memory_space<vmem>>) attributes {dimension_semantics = [#tpu.dimension_semantics<parallel>, #tpu.dimension_semantics<parallel>], iteration_bounds = array<i64: 2, 1>, scalar_prefetch = 0 : i64, scratch_operands = 0 : i64, tpu.core_type = #tpu.core_type<tc>, window_params = [{transform_indices = @transform_0, window_bounds = array<i64: 16, 384>}, {transform_indices = @transform_1, window_bounds = array<i64: 256, 128>}, {transform_indices = @transform_2, window_bounds = array<i64: 16, 128>}]} {
    %c0 = arith.constant 0 : index
    %c0_0 = arith.constant 0 : index
    %0 = vector.load %arg2[%c0, %c0_0] : memref<16x384xf32, #tpu.memory_space<vmem>>, vector<16x128xf32>
    %c0_1 = arith.constant 0 : index
    %c128 = arith.constant 128 : index
    %1 = vector.load %arg2[%c0_1, %c128] : memref<16x384xf32, #tpu.memory_space<vmem>>, vector<16x128xf32>
    %c0_2 = arith.constant 0 : index
    %c256 = arith.constant 256 : index
    %2 = vector.load %arg2[%c0_2, %c256] : memref<16x384xf32, #tpu.memory_space<vmem>>, vector<16x128xf32>
    %3 = arith.addf %1, %2 : vector<16x128xf32>
    %4 = arith.truncf %0 : vector<16x128xf32> to vector<16x128xbf16>
    %5 = arith.truncf %3 : vector<16x128xf32> to vector<16x128xbf16>
    %6 = tpu.concatenate %4, %5 in 1 : vector<16x128xbf16>, vector<16x128xbf16> -> vector<16x256xbf16>
    %c0_3 = arith.constant 0 : index
    %c0_4 = arith.constant 0 : index
    %7 = vector.load %arg3[%c0_3, %c0_4] : memref<256x128xbf16, #tpu.memory_space<vmem>>, vector<256x128xbf16>
    %cst = arith.constant dense<0.000000e+00> : vector<16x128xf32>
    %8 = tpu.matmul %6, %7, %cst {dimension_numbers = #tpu.dot_dimension_numbers<[1], [0], [0], [1], [0, 0, 1, 1], [], []>} : vector<16x256xbf16>, vector<256x128xbf16>, vector<16x128xf32> -> vector<16x128xf32>
    %c0_5 = arith.constant 0 : index
    %c0_6 = arith.constant 0 : index
    %9 = vector.load %arg4[%c0_5, %c0_6] : memref<16x128xf32, #tpu.memory_space<vmem>>, vector<16x128xf32>
    tpu.vector_store %arg4[%c0_5, %c0_6], %8 {strides = array<i32>} : memref<16x128xf32, #tpu.memory_space<vmem>>, vector<16x128xf32>,
    return
  }
  func.func @transform_0(%arg0: i32, %arg1: i32) -> (i32, i32) {
    %c0_i32 = arith.constant 0 : i32
    %c0_i32_0 = arith.constant 0 : i32
    return %arg1, %c0_i32 : i32, i32
  }
  func.func @transform_1(%arg0: i32, %arg1: i32) -> (i32, i32) {
    %c0_i32 = arith.constant 0 : i32
    %c0_i32_0 = arith.constant 0 : i32
    return %c0_i32, %arg0 : i32, i32
  }
  func.func @transform_2(%arg0: i32, %arg1: i32) -> (i32, i32) {
    %c0_i32 = arith.constant 0 : i32
    return %arg1, %arg0 : i32, i32
  }
}

</mosaic_0001>

<bundles_post_ra>
// kernel: tpu_custom_call.1
= control target key start
LH: loop header
LB: loop body
LE: loop exit
PB: predicated region body
PF: predicated region fallthrough
CT: control target
= control target key end

     0   :  { %7 = vsyncpa [#allocation3], 0  ;;  %s1006_s0 = inlined_call_operand.hbm [shape: f32[16,384], index: 0, kind: input, shape index: {}]   ;;  %s1007_s1 = inlined_call_operand.hbm [shape: bf16[256,256], index: 1, kind: input, shape index: {}]   ;;  %s1008_s2 = inlined_call_operand.hbm [shape: f32[16,256], index: 2, kind: output, shape index: {}]  }
   0x1   :  { %8 = vsyncpa [#allocation6], 0 }
   0x2   :  { %10 = vsyncpa [#allocation6 + $0x1], 0 }
   0x3   :  { %11 = vsyncpa [#allocation4], 0 }
   0x4   :  { %13 = vsyncpa [#allocation4 + $0x1], 0  ;;  %s812_s9 = smov 0   ;;  %s814_s10 = smov 0  }
   0x5   :  { %s816_s11 = smov 0   ;;  %s818_s12 = smov 0  }
   0x6   :  { %s820_s13 = smov 0   ;;  %s822_s14 = smov 0  }
   0x7 LB: > { %1013 = sst [smem:[#allocation11_spill]] %s784_s14  ;;  %s496_s15 = sadd.s32 4294967295, %s784_s14   ;;  %s784_s14 = sphi %s822_s14, %s1032_s14   ;;  %s780_s13 = sphi %s820_s13, %s1031_s13   ;;  %s776_s12 = sphi %s818_s12, %s1030_s12   ;;  %s772_s11 = sphi %s816_s11, %s1029_s11   ;;  %s768_s10 = sphi %s814_s10, %s1028_s10   ;;  %s764_s9 = sphi %s812_s9, %s1027_s9  }
   0x8   : > { %s497_s16 = sadd.s32 4294967294, %s784_s14   ;;  %p71_p0 = scmp.ne.s32.totalorder %s772_s11, %s768_s10 }
   0x9   : > { %p72_p1 = scmp.eq.s32.totalorder %s784_s14, 0  ;;  %p77_p2 = scmp.ne.s32.totalorder %s768_s10, %s764_s9 }
   0xa   : > { %p849_p3 = scmp.eq.s32.totalorder %s496_s15, 0  ;;  %p103_p5 = scmp.eq.s32.totalorder %s496_s15, 1 }
   0xb   : > { %p853_p4 = por %p72_p1, %p71_p0  ;;  %p109_p7 = scmp.eq.s32.totalorder %s497_s16, 1 }
   0xc   : > { %p859_p6 = por %p849_p3, %p77_p2  ;;  %p863_p8 = por %p103_p5, %p71_p0 }
   0xd   : > { %p498_p9 = scmp.ge.s32.totalorder %s784_s14, 1  ;;  %p868_p10 = por %p109_p7, %p77_p2 }
   0xe   : > { %s1016_s19 = scalar_select %p859_p6, 1, 0 }
   0xf   : > { %s1017_s20 = scalar_select %p863_p8, 1, 0 }
  0x10   : > { %s1018_s21 = scalar_select %p868_p10, 1, 0 }
  0x11   : > { %p116_p11 = scmp.lt.s32.totalorder %s784_s14, 3  ;;  %s786_s23 = smov [#allocation2]  }
  0x12   : > { %s132_s24 = sshll.u32 %s786_s23, 4  ;;  %p570_p1 = scmp.lt.s32.totalorder %s784_s14, 2  ;;  %s133_s24 = int_to_ptr.vmem [resolvable:$true] %s132_s24 }
  0x13   : > { %p873_p12 = pnand %p498_p9, %p116_p11  ;;  %s31_s27 = sadd.s32 1, %s780_s13 }
  0x14   : > { %p889_p2 = pnand %p570_p1, %p853_p4  ;;  %s657_s28 = scalar_lea.vmem %s133_s24, 768 }
  0x15   : > { %p557_p13 = pneg %p873_p12  ;;  %p658_p9 = scmp.ne.s32.totalorder %s133_s24, %s657_s28 }
  0x16   : > { %p665_p0 = scmp.lt.s32.totalorder %s133_s24, %s133_s24  ;;  %p666_p8 = scmp.lt.s32.totalorder %s657_s28, %s657_s28 }
  0x17   : > { %p883_p5 = pnand %p557_p13, %p849_p3 }
  0x18   : > { %p667_p6 = por %p666_p8, %p665_p0 }
  0x19   : > { %p648_p7 = pneg %p883_p5 }
  0x1b   : > { %p660_p11 = pnand %p658_p9, %p648_p7 }
  0x1d   : > { %p661_p10 = pneg %p660_p11 }
  0x1f   : > { %p668_p13 = pnand %p667_p6, %p661_p10 }
  0x21   : > { %671 = shalt.err (!%p668_p13)
}
  0x22   : > { %s787_s29 = smov 384   ;;  %s788_s30 = smov 24  }
  0x23   : > { %560 = dma.hbm_to_vmem [thread:$0]  (!%p883_p5), %s1006_s0, 768, %s133_s24, [#allocation3], %s787_s29, %s787_s29, %s788_s30  }
  0x24   : > { %p33_p4 = scmp.ge.s32.totalorder %s31_s27, 2  ;;  %s64_s5 = sadd.s32 1, %s772_s11 }
  0x25   : > { %s146_s6 = sand.u32 1, %s772_s11   ;;  %s502_s15 = sshll.u32 %s780_s13, 6 }
  0x26   : > { %s1034_s27 = smov (%p33_p4, %s31_s27), 0  ;;  %s501_s7 = sshll.u32 %s146_s6, 7 }
  0x27   : > { %s61_s8 = ssub.s32 %s780_s13, %s1034_s27  ;;  %s155_s23 = scalar_lea.hbm %s1007_s1, %s502_s15 }
  0x28   : > { %p62_p6 = scmp.eq.s32.totalorder %s61_s8, 0  ;;  %s150_s25 = scalar_lea.vmem [#allocation5], %s501_s7 }
  0x29   : > { %s156_s28 = sshll.u32 %s150_s25, 4  ;;  %s147_s24 = scalar_lea.sflag [#allocation6], %s146_s6  ;;  %s157_s28 = int_to_ptr.vmem [resolvable:$true] %s156_s28 }
  0x2a   : > { %s912_s14 = scalar_select %p62_p6, %s772_s11, %s64_s5  }
  0x2b   : > { %p674_p8 = pneg %p889_p2  ;;  %s685_s29 = scalar_lea.vmem %s157_s28, 2048 }
  0x2c   : > { %p686_p10 = scmp.ne.s32.totalorder %s157_s28, %s685_s29  ;;  %s789_s30 = smov [#allocation5]  }
  0x2d   : > { %s690_s3 = sshll.u32 %s789_s30, 4  ;;  %s691_s3 = int_to_ptr.vmem [resolvable:$false] %s690_s3 }
  0x2e   : > { %p688_p0 = pnand %p686_p10, %p674_p8  ;;  %s692_s4 = scalar_lea.vmem %s691_s3, 4096 }
  0x2f   : > { %p693_p5 = scmp.lt.s32.totalorder %s157_s28, %s691_s3  ;;  %p694_p7 = scmp.lt.s32.totalorder %s692_s4, %s685_s29 }
  0x30   : > { %p689_p1 = pneg %p688_p0 }
  0x31   : > { %p695_p9 = por %p694_p7, %p693_p5 }
  0x33   : > { %p696_p11 = pnand %p695_p9, %p689_p1 }
  0x35   : > { %699 = shalt.err (!%p696_p11)
}
  0x36   : > { %s790_s7 = smov 128   ;;  %s791_s5 = smov 64  }
  0x37   : > { %s792_s8 = smov 4   ;;  %168 = sbr.rel (%p873_p12) target bundleno = 314 (0x13a), region = 28 }
  0x38   : > { %564 = dma.hbm_to_vmem [thread:$0]  (!%p889_p2), %s155_s23, 2048, %s157_s28, %s147_s24, %s790_s7, %s791_s5, %s792_s8  }
  0x3c   : > { %751 = dma.done.wait (%p849_p3), [#allocation3], 768  }
  0x3d   : > { %753 = vsyncadd (%p849_p3), [#allocation3], 4294966528  ;;  %s925_s6 = sand.u32 1, %s768_s10   ;;  %p1022_p2 = scmp.ne.s32.totalorder %s1016_s19, 0 }
  0x3e   : > { %s505_s15 = sshll.u32 %s925_s6, 7  ;;  %s175_s16 = scalar_lea.sflag [#allocation6], %s925_s6 }
  0x3f   : > { %s929_s18 = scalar_lea.vmem [#allocation5], %s505_s15 }
  0x40   : > { %755 = dma.done.wait (%p1022_p2), %s175_s16, 2048  }
  0x41   : > { %757 = vsyncadd (%p1022_p2), %s175_s16, 4294965248  ;;  %v630_v0 = vld [vmem:[%s929_s18 + $0x78] sm:$0xff]   ;;  %v632_v2 = vld [vmem:[%s929_s18 + $0x70] sm:$0xff]   ;;  %s506_s17 = sshll.u32 %s925_s6, 4  ;;  %s524_s26 = sshll.u32 %s776_s12, 7 }
  0x42   : > { %v631_v1 = vld [vmem:[%s929_s18 + $0x38] sm:$0xff]   ;;  %527 = vmatprep.subr.bf16.mxu0 %v630_v0  ;;  %v633_v3 = vld [vmem:[%s929_s18 + $0x30] sm:$0xff]   ;;  %v634_v4 = vld [vmem:[%s929_s18 + $0x68] sm:$0xff]   ;;  %s198_s19 = scalar_lea.vmem [#allocation7], %s506_s17  ;;  %s958_s28 = scalar_lea.hbm %s1008_s2, %s524_s26 }
  0x43   : > { %528 = vmatpush3.bf16.msra.mxu0 %v631_v1  ;;  %v635_v5 = vld [vmem:[%s929_s18 + $0x28] sm:$0xff]   ;;  %v636_v6 = vld [vmem:[%s929_s18 + $0x60] sm:$0xff]   ;;  %v638_v8 = vld [vmem:[%s929_s18 + $0x58] sm:$0xff]   ;;  %s399_s22 = sshll.u32 %s198_s19, 4  ;;  %s384_s24 = scalar_lea.sflag [#allocation4], %s925_s6  ;;  %s953_s22 = int_to_ptr.vmem [resolvable:$true] %s399_s22 }
  0x44   : > { %529 = vmatprep.subr.bf16.mxu0 %v632_v2  ;;  %v637_v7 = vld [vmem:[%s929_s18 + $0x20] sm:$0xff]   ;;  %v639_v9 = vld [vmem:[%s929_s18 + $0x18] sm:$0xff]   ;;  %v640_v10 = vld [vmem:[%s929_s18 + $0x50] sm:$0xff]   ;;  %s700_s29 = scalar_lea.vmem %s953_s22, 256  ;;  %p1023_p12 = scmp.ne.s32.totalorder %s1017_s20, 0 }
  0x45   : > { %v204_v11 = vld [vmem:[#allocation2 + $0x8] sm:$0xff]  ;;  %v205_v12 = vld [vmem:[#allocation2 + $0x20] sm:$0xff]  ;;  %v206_v13 = vld [vmem:[#allocation2 + $0x10] sm:$0xff]  ;;  %p701_p3 = scmp.ne.s32.totalorder %s953_s22, %s700_s29  ;;  %s793_s12 = smov [#allocation7]  }
  0x46   : > { %v207_v14 = vld [vmem:[#allocation2 + $0x28] sm:$0xff]  ;;  %v208_v15 = vadd.f32 %v206_v13, %v204_v11  ;;  %v641_v17 = vld [vmem:[%s929_s18 + $0x10] sm:$0xff]   ;;  %v642_v18 = vld [vmem:[%s929_s18 + $0x48] sm:$0xff]   ;;  %s704_s30 = sshll.u32 %s793_s12, 4  ;;  %s705_s30 = int_to_ptr.vmem [resolvable:$false] %s704_s30 }
  0x47   : > { %530 = vmatpush3.bf16.msra.mxu0 %v633_v3  ;;  %v209_v16 = vadd.f32 %v207_v14, %v205_v12  ;;  %v643_v20 = vld [vmem:[%s929_s18 + $0x8] sm:$0xff]   ;;  %v644_v21 = vld [vmem:[%s929_s18 + $0x40] sm:$0xff]   ;;  %v202_v23 = vld [vmem:[#allocation2] sm:$0xff]  ;;  %p702_p13 = pnand %p701_p3, %p1023_p12  ;;  %s706_s3 = scalar_lea.vmem %s705_s30, 512 }
  0x48   : > { %531 = vmatprep.subr.bf16.mxu0 %v634_v4  ;;  %v645_v22 = vld [vmem:[%s929_s18] sm:$0xff]   ;;  %v203_v24 = vld [vmem:[#allocation2 + $0x18] sm:$0xff]  ;;  %p707_p6 = scmp.lt.s32.totalorder %s953_s22, %s705_s30  ;;  %p708_p8 = scmp.lt.s32.totalorder %s706_s3, %s700_s29 }
  0x49   : > { %v211_v19 = vpack.c.bf16 %v209_v16, %v208_v15  ;;  %v210_v25 = vpack.c.bf16 %v203_v24, %v202_v23  ;;  %p703_p4 = pneg %p702_p13 }
  0x4a   : > { %p709_p10 = por %p708_p8, %p707_p6 }
  0x4b   : > { %532 = vmatpush3.bf16.msra.mxu0 %v635_v5  ;;  %372 = vmatprep.mubr.bf16.mxu0 %v211_v19 }
  0x4c   : > { %533 = vmatprep.subr.bf16.mxu0 %v636_v6  ;;  %p710_p0 = pnand %p709_p10, %p703_p4 }
  0x4f   : > { %534 = vmatpush3.bf16.msra.mxu0 %v637_v7 }
  0x50   : > { %535 = vmatprep.subr.bf16.mxu0 %v638_v8 }
  0x53   : > { %536 = vmatpush3.bf16.msra.mxu0 %v639_v9 }
  0x54   : > { %537 = vmatprep.subr.bf16.mxu0 %v640_v10 }
  0x57   : > { %538 = vmatpush3.bf16.msra.mxu0 %v641_v17 }
  0x58   : > { %539 = vmatprep.subr.bf16.mxu0 %v642_v18 }
  0x5b   : > { %540 = vmatpush3.bf16.msra.mxu0 %v643_v20 }
  0x5c   : > { %541 = vmatprep.subr.bf16.mxu0 %v644_v21 }
  0x5f   : > { %542 = vmatpush3.bf16.msra.mxu0 %v645_v22 }
  0x62   : > { %373 = vmatmul.mubr.bf16.vlgmr.msra.gmra.mxu0 %v210_v25 }
 0x122   : > { %v543_v26 = vpop.f32.mrf.mxu0 }
 0x124   : > { %v544_v27 = vpop.f32.mrf.mxu0 }
 0x125   : > { %v545_v28 = vadd.f32 %v544_v27, %v543_v26 }
 0x126   : > { %v546_v29 = vpop.f32.mrf.mxu0 }
 0x127   : > { %381 = vst [vmem:[%s198_s19] sm:$0xff] %v545_v28 }
 0x128   : > { %v547_v30 = vpop.f32.mrf.mxu0 }
 0x129   : > { %v548_v31 = vadd.f32 %v547_v30, %v546_v29 }
 0x12b   : > { %382 = vst [vmem:[%s198_s19 + $0x8] sm:$0xff] %v548_v31 }
 0x12c   : > { %713 = shalt.err (!%p710_p0)
}
 0x12d   : > { %s714_s4 = scalar_lea.hbm %s958_s28, 256  ;;  %s718_s8 = scalar_lea.hbm %s1008_s2, 512 }
 0x12e   : > { %p715_p1 = scmp.ne.s32.totalorder %s958_s28, %s714_s4  ;;  %p719_p9 = scmp.lt.s32.totalorder %s958_s28, %s1008_s2 }
 0x12f   : > { %p720_p11 = scmp.lt.s32.totalorder %s718_s8, %s714_s4 }
 0x130   : > { %p716_p5 = pnand %p715_p1, %p1023_p12 }
 0x131   : > { %p721_p2 = por %p720_p11, %p719_p9 }
 0x132   : > { %p717_p7 = pneg %p716_p5 }
 0x134   : > { %p722_p3 = pnand %p721_p2, %p717_p7 }
 0x136   : > { %725 = shalt.err (!%p722_p3)
}
 0x137   : > { %s794_s18 = smov 128   ;;  %s795_s17 = smov 256  }
 0x138   : > { %s796_s19 = smov 8  }
 0x139   : > { %555 = dma.vmem_to_hbm [thread:$0]  (%p1023_p12), %s953_s22, 256, %s958_s28, %s384_s24, %s794_s18, %s795_s17, %s796_s19  }
 0x13a PF: > { %s1024_s26 = sld [smem:[#allocation11_spill]]  ;;  %s414_s23 = sand.u32 1, %s764_s9  }
 0x13b   : > { %p1025_p13 = scmp.ne.s32.totalorder %s1018_s21, 0  ;;  %s415_s25 = scalar_lea.sflag [#allocation4], %s414_s23 }
 0x140   : > { %p1026_p4 = scmp.ge.s32.totalorder %s1024_s26, 2 }
 0x142   : > { %p566_p6 = pnand %p1026_p4, %p1025_p13 }
 0x144   : > { %p567_p8 = pneg %p566_p6 }
 0x146   : > { %759 = dma.done.wait (%p567_p8), %s415_s25, 256  }
 0x147   : > { %761 = vsyncadd (%p567_p8), %s415_s25, 4294967040  ;;  %s19_s29 = sadd.s32 1, %s1024_s26   ;;  %s1027_s9 = smov %s768_s10 }
 0x148   : > { %p16_p10 = scmp.ge.s32.totalorder %s19_s29, 4   ;;  %s1028_s10 = smov %s772_s11 }
 0x149   : > { %s1029_s11 = smov %s912_s14  ;;  %s1030_s12 = smov %s780_s13 }
 0x14a   : > { %s1031_s13 = smov %s1034_s27  ;;  %s1032_s14 = smov %s19_s29 }
 0x14b   :  { %18 = sbr.rel (!%p16_p10) target bundleno = 7 (0x7), region = 79 }
 0x150   :  { %420 = vsyncpa [#allocation3], 1 }
 0x151   :  { %422 = vsyncpa [#allocation3 + $0x1], 1 }
 0x152   :  { %423 = vsyncpa [#allocation6], 1 }
 0x153   :  { %425 = vsyncpa [#allocation6 + $0x1], 1 }
 0x154   :  { %426 = vsyncpa [#allocation4], 1 }
 0x155   :  { %428 = vsyncpa [#allocation4 + $0x1], 1 }

</bundles_post_ra>
